<compile_context>
chip_gen: v7x
topology: tpu7x:2x2x1
jax: 0.10.0
libtpu: 0.0.40
codegen_flags: <defaults>
</compile_context>

<pallas_src>
import functools

import jax
import jax.numpy as jnp
from jax.experimental import pallas as pl
from jax.experimental.pallas import tpu as pltpu


_LANE = 128          # TPU lane width; time-tile granularity
_HALO_BLOCK = 128    # halo window fetched from the start of the next tile (covers K-1 <= 128 taps)


def _round_up(x, m):
    return (x + m - 1) // m * m


def _vmem_limit_bytes():
    """Scoped VMEM limit per generation: ~96 MiB on v5e/v6e (128 MiB), ~48 MiB on v7x (64 MiB)."""
    try:
        cap = int(pltpu.get_tpu_info().vmem_capacity_bytes)
        return min(cap * 3 // 4, 100 * 1024 * 1024)
    except Exception:
        return 48 * 1024 * 1024  # conservative fallback (safe on every generation)


def _vmem_estimate(TT, C_in, C_out, K, in_bytes, out_bytes):
    """Explicit double-buffered working-set estimate for one grid step."""
    main = 2 * C_in * TT * in_bytes                    # input time tile (2x pipelined)
    halo = 2 * C_in * _HALO_BLOCK * in_bytes           # halo block (2x pipelined)
    outp = 2 * C_out * TT * out_bytes                  # output tile (2x pipelined)
    wgt = 2 * K * C_out * C_in * in_bytes              # conv weights (constant index, still 2x buffered)
    prm = 2 * 3 * C_out * 4                            # bias/gamma/beta
    tmp = C_in * (TT + _HALO_BLOCK) * in_bytes         # in-kernel window (bf16)
    tmp += 3 * C_out * TT * 4                          # f32 accumulator + LayerNorm temporaries
    return main + halo + outp + wgt + prm + tmp


def _pick_time_tile(T, B, C_in, C_out, K, in_bytes, out_bytes, vmem_limit, requested):
    if requested is not None:
        target = max(int(requested), _LANE)
    else:
        # Bigger tiles on 128-MiB-VMEM parts (v5e/v6e); 1024 on v7x's 64 MiB.
        target = 2048 if vmem_limit >= 64 * 1024 * 1024 else 1024
    TT = min(_round_up(target, _LANE), _round_up(T, _LANE))
    # Keep both v7x TensorCores busy when B == 1 (time is then the only parallel axis).
    if B == 1 and T > _LANE:
        TT = min(TT, _round_up(-(-T // 2), _LANE))
    # Shrink until the working set fits the VMEM budget (leave headroom for Mosaic scratch).
    budget = int(vmem_limit * 0.6)
    while TT > _LANE and _vmem_estimate(TT, C_in, C_out, K, in_bytes, out_bytes) > budget:
        TT = _round_up(TT // 2, _LANE)
    return max(TT, _LANE)


def _conv_relu_norm_kernel(xm_ref, xh_ref, w_ref, b_ref, g_ref, be_ref, o_ref, *, K, eps):
    # xm_ref: (1, C_in, TT)     current time tile of the padded input (compute dtype, e.g. bf16)
    # xh_ref: (1, C_in, 128)    halo: first 128 columns of the next tile (covers the K-1 overhang)
    # w_ref : (K, C_out, C_in)  conv taps, w_ref[k] = weight[:, :, k]
    # b_ref : (C_out, 1) f32    conv bias
    # g_ref : (C_out, 1) f32    LayerNorm weight (gamma)
    # be_ref: (C_out, 1) f32    LayerNorm bias (beta)
    # o_ref : (1, C_out, TT)    output tile, time on the lane axis (lane-dense stores)
    TT = o_ref.shape[-1]
    xm = xm_ref[0]                                             # (C_in, TT)
    if K == 1:
        xw = xm
    else:
        # Single aligned copy to form the conv window (no K-wide im2col materialization).
        xw = jnp.concatenate([xm, xh_ref[0]], axis=-1)         # (C_in, TT + 128)

    # Conv1d as K accumulating MXU dots on shifted windows; f32 accumulation.
    acc = jnp.dot(w_ref[0], xw[:, 0:TT], preferred_element_type=jnp.float32)
    for k in range(1, K):
        acc = acc + jnp.dot(w_ref[k], xw[:, k:k + TT],
                            preferred_element_type=jnp.float32)

    # Bias + ReLU (f32).
    acc = jnp.maximum(acc + b_ref[...], 0.0)

    # LayerNorm over the channel (sublane) axis, single-pass moments, biased variance, f32.
    inv_c = 1.0 / acc.shape[0]
    mean = jnp.sum(acc, axis=0, keepdims=True) * inv_c         # (1, TT)
    ex2 = jnp.sum(acc * acc, axis=0, keepdims=True) * inv_c    # (1, TT)
    var = ex2 - mean * mean
    inv_std = jax.lax.rsqrt(var + eps)
    out = (acc - mean) * inv_std * g_ref[...] + be_ref[...]

    # Dropout(p=0.0) / eval mode -> identity.
    o_ref[0] = out.astype(o_ref.dtype)


def conv_relu_norm(signal, weight, bias, gamma, beta, *, eps=1e-5,
                   time_tile=None, compute_dtype=jnp.bfloat16):
    """signal: (B, C_in, T) [PyTorch NCT]; weight: (C_out, C_in, K).

    Returns (B, C_out, T) in signal.dtype, matching ConvReLUNorm.forward in eval / p=0 dropout.
    Matmul operands are cast to `compute_dtype` (bf16 by default); accumulation and
    LayerNorm run in f32.  Pass compute_dtype=None to keep the input dtype.
    """
    B, C_in, T = signal.shape
    C_out, c_in_w, K = weight.shape
    assert c_in_w == C_in, "weight C_in mismatch"
    if K % 2 == 0:
        # PyTorch Conv1d with padding=K//2 yields T+1 outputs for even K; not supported here.
        raise NotImplementedError("even kernel_size is not supported")
    pad = K // 2
    assert K - 1 <= _HALO_BLOCK, "kernel_size too large for the fixed halo block"

    in_dt = jnp.dtype(signal.dtype) if compute_dtype is None else jnp.dtype(compute_dtype)
    out_dt = signal.dtype

    vmem_limit = _vmem_limit_bytes()
    TT = _pick_time_tile(T, B, C_in, C_out, K,
                         in_bytes=in_dt.itemsize, out_bytes=jnp.dtype(out_dt).itemsize,
                         vmem_limit=vmem_limit, requested=time_tile)
    nT = -(-T // TT)                 # ceil-div
    T_out = nT * TT                  # lane-aligned (padded) output length
    L = T_out + _HALO_BLOCK          # padded input length (room for every halo block)

    # Single contiguous pad along the minor time axis, fused with the compute-dtype cast.
    x_pad = jnp.pad(signal, ((0, 0), (0, 0), (pad, L - pad - T))).astype(in_dt)

    # Weights as (K, C_out, C_in) so each tap is a clean leading-axis slice in-kernel.
    w3 = jnp.transpose(weight, (2, 0, 1)).astype(in_dt)
    b2 = bias.reshape(C_out, 1).astype(jnp.float32)
    g2 = gamma.reshape(C_out, 1).astype(jnp.float32)
    be2 = beta.reshape(C_out, 1).astype(jnp.float32)

    kernel = functools.partial(_conv_relu_norm_kernel, K=K, eps=float(eps))
    halo_stride = TT // _HALO_BLOCK  # block-index step of the halo window

    out_padded = pl.pallas_call(
        kernel,
        out_shape=jax.ShapeDtypeStruct((B, C_out, T_out), out_dt),
        grid_spec=pltpu.PrefetchScalarGridSpec(
            num_scalar_prefetch=0,
            grid=(B, nT),
            in_specs=[
                # Current time tile of the padded input.
                pl.BlockSpec((1, C_in, TT), lambda b, t: (b, 0, t)),
                # 128-wide halo: first columns of the next tile (covers the K-1 overhang).
                pl.BlockSpec((1, C_in, _HALO_BLOCK),
                             lambda b, t: (b, 0, (t + 1) * halo_stride)),
                # Parameters: full blocks, constant index maps (stay resident).
                pl.BlockSpec((K, C_out, C_in), lambda b, t: (0, 0, 0)),
                pl.BlockSpec((C_out, 1), lambda b, t: (0, 0)),
                pl.BlockSpec((C_out, 1), lambda b, t: (0, 0)),
                pl.BlockSpec((C_out, 1), lambda b, t: (0, 0)),
            ],
            out_specs=pl.BlockSpec((1, C_out, TT), lambda b, t: (b, 0, t)),
        ),
        compiler_params=pltpu.CompilerParams(
            dimension_semantics=("parallel", "parallel"),
            vmem_limit_bytes=vmem_limit,
        ),
    )(x_pad, x_pad, w3, b2, g2, be2)

    return out_padded if T_out == T else out_padded[:, :, :T]


if __name__ == "__main__":
    key = jax.random.PRNGKey(0)
    B, C_in, C_out, T, K = 2, 8, 8, 16, 3

    k_sig, k_w, k_b, k_g, k_be = jax.random.split(key, 5)
    signal = jax.random.normal(k_sig, (B, C_in, T), dtype=jnp.float32)
    # Deterministic parameter init (shapes per torch.nn.Conv1d / LayerNorm).
    weight = 0.1 * jax.random.normal(k_w, (C_out, C_in, K), dtype=jnp.float32)
    bias = 0.1 * jax.random.normal(k_b, (C_out,), dtype=jnp.float32)
    gamma = 1.0 + 0.05 * jax.random.normal(k_g, (C_out,), dtype=jnp.float32)
    beta = 0.05 * jax.random.normal(k_be, (C_out,), dtype=jnp.float32)

    out = conv_relu_norm(signal, weight, bias, gamma, beta)
    jax.block_until_ready(out)

    # Pure-JAX reference with the same bf16 matmul operands (f32 accumulation, f32 LayerNorm),
    # i.e. the kernel's compute path; tolerance covers accumulation-order differences.
    sig_c = signal.astype(jnp.bfloat16)
    w_c = weight.astype(jnp.bfloat16)
    conv_ref = jax.lax.conv_general_dilated(
        sig_c, w_c, window_strides=(1,), padding=[(K // 2, K // 2)],
        dimension_numbers=("NCH", "OIH", "NCH"),
        preferred_element_type=jnp.float32)
    y = jax.nn.relu(conv_ref + bias[None, :, None])
    mu = jnp.mean(y, axis=1, keepdims=True)
    var = jnp.mean((y - mu) ** 2, axis=1, keepdims=True)
    ref = (y - mu) * jax.lax.rsqrt(var + 1e-5) * gamma[None, :, None] + beta[None, :, None]

    assert out.shape == ref.shape, (out.shape, ref.shape)
    max_err = float(jnp.max(jnp.abs(out - ref)))
    assert jnp.allclose(out, ref, atol=2e-3, rtol=2e-3), f"mismatch vs reference (max err {max_err})"

    print("KERNEL_OK")
</pallas_src>

<mosaic_0001>
module attributes {stable_mosaic.version = 11 : i64} {
  func.func @_conv_relu_norm_kernel(%arg0: i32, %arg1: i32, %arg2: memref<1x8x128xbf16, #tpu.memory_space<vmem>>, %arg3: memref<1x8x128xbf16, #tpu.memory_space<vmem>>, %arg4: memref<3x8x8xbf16, #tpu.memory_space<vmem>>, %arg5: memref<8x1xf32, #tpu.memory_space<vmem>>, %arg6: memref<8x1xf32, #tpu.memory_space<vmem>>, %arg7: memref<8x1xf32, #tpu.memory_space<vmem>>, %arg8: memref<1x8x128xf32, #tpu.memory_space<vmem>>) attributes {dimension_semantics = [#tpu.dimension_semantics<parallel>, #tpu.dimension_semantics<parallel>], iteration_bounds = array<i64: 2, 1>, scalar_prefetch = 0 : i64, scratch_operands = 0 : i64, tpu.core_type = #tpu.core_type<tc>, window_params = [{transform_indices = @transform_0, window_bounds = array<i64: 1, 8, 128>}, {transform_indices = @transform_1, window_bounds = array<i64: 1, 8, 128>}, {pipeline_mode = #tpu.pipeline_mode<synchronous>, transform_indices = @transform_2, window_bounds = array<i64: 3, 8, 8>}, {pipeline_mode = #tpu.pipeline_mode<synchronous>, transform_indices = @transform_3, window_bounds = array<i64: 8, 1>}, {pipeline_mode = #tpu.pipeline_mode<synchronous>, transform_indices = @transform_4, window_bounds = array<i64: 8, 1>}, {pipeline_mode = #tpu.pipeline_mode<synchronous>, transform_indices = @transform_5, window_bounds = array<i64: 8, 1>}, {transform_indices = @transform_6, window_bounds = array<i64: 1, 8, 128>}]} {
    %c0 = arith.constant 0 : index
    %c0_0 = arith.constant 0 : index
    %c0_1 = arith.constant 0 : index
    %0 = vector.load %arg2[%c0, %c0_0, %c0_1] : memref<1x8x128xbf16, #tpu.memory_space<vmem>>, vector<1x8x128xbf16>
    %1 = vector.shape_cast %0 : vector<1x8x128xbf16> to vector<8x128xbf16>
    %c0_2 = arith.constant 0 : index
    %c0_3 = arith.constant 0 : index
    %c0_4 = arith.constant 0 : index
    %2 = vector.load %arg3[%c0_2, %c0_3, %c0_4] : memref<1x8x128xbf16, #tpu.memory_space<vmem>>, vector<1x8x128xbf16>
    %3 = vector.shape_cast %2 : vector<1x8x128xbf16> to vector<8x128xbf16>
    %4 = tpu.concatenate %1, %3 in 1 : vector<8x128xbf16>, vector<8x128xbf16> -> vector<8x256xbf16>
    %c0_5 = arith.constant 0 : index
    %c0_6 = arith.constant 0 : index
    %c0_7 = arith.constant 0 : index
    %5 = vector.load %arg4[%c0_5, %c0_6, %c0_7] : memref<3x8x8xbf16, #tpu.memory_space<vmem>>, vector<1x8x8xbf16>
    %6 = vector.shape_cast %5 : vector<1x8x8xbf16> to vector<8x8xbf16>
    %7 = vector.extract_strided_slice %4 {offsets = [0, 0], sizes = [8, 128], strides = [1, 1]} : vector<8x256xbf16> to vector<8x128xbf16>
    %cst = arith.constant dense<0.000000e+00> : vector<8x128xf32>
    %8 = tpu.matmul %6, %7, %cst {dimension_numbers = #tpu.dot_dimension_numbers<[1], [0], [0], [1], [0, 0, 1, 1], [], []>} : vector<8x8xbf16>, vector<8x128xbf16>, vector<8x128xf32> -> vector<8x128xf32>
    %c1 = arith.constant 1 : index
    %c0_8 = arith.constant 0 : index
    %c0_9 = arith.constant 0 : index
    %9 = vector.load %arg4[%c1, %c0_8, %c0_9] : memref<3x8x8xbf16, #tpu.memory_space<vmem>>, vector<1x8x8xbf16>
    %10 = vector.shape_cast %9 : vector<1x8x8xbf16> to vector<8x8xbf16>
    %11 = vector.extract_strided_slice %4 {offsets = [0, 1], sizes = [8, 128], strides = [1, 1]} : vector<8x256xbf16> to vector<8x128xbf16>
    %cst_10 = arith.constant dense<0.000000e+00> : vector<8x128xf32>
    %12 = tpu.matmul %10, %11, %cst_10 {dimension_numbers = #tpu.dot_dimension_numbers<[1], [0], [0], [1], [0, 0, 1, 1], [], []>} : vector<8x8xbf16>, vector<8x128xbf16>, vector<8x128xf32> -> vector<8x128xf32>
    %13 = arith.addf %8, %12 : vector<8x128xf32>
    %c2 = arith.constant 2 : index
    %c0_11 = arith.constant 0 : index
    %c0_12 = arith.constant 0 : index
    %14 = vector.load %arg4[%c2, %c0_11, %c0_12] : memref<3x8x8xbf16, #tpu.memory_space<vmem>>, vector<1x8x8xbf16>
    %15 = vector.shape_cast %14 : vector<1x8x8xbf16> to vector<8x8xbf16>
    %16 = vector.extract_strided_slice %4 {offsets = [0, 2], sizes = [8, 128], strides = [1, 1]} : vector<8x256xbf16> to vector<8x128xbf16>
    %cst_13 = arith.constant dense<0.000000e+00> : vector<8x128xf32>
    %17 = tpu.matmul %15, %16, %cst_13 {dimension_numbers = #tpu.dot_dimension_numbers<[1], [0], [0], [1], [0, 0, 1, 1], [], []>} : vector<8x8xbf16>, vector<8x128xbf16>, vector<8x128xf32> -> vector<8x128xf32>
    %18 = arith.addf %13, %17 : vector<8x128xf32>
    %c0_14 = arith.constant 0 : index
    %c0_15 = arith.constant 0 : index
    %19 = vector.load %arg5[%c0_14, %c0_15] : memref<8x1xf32, #tpu.memory_space<vmem>>, vector<8x1xf32>
    %20 = vector.broadcast %19 : vector<8x1xf32> to vector<8x128xf32>
    %21 = arith.addf %18, %20 : vector<8x128xf32>
    %cst_16 = arith.constant 0.000000e+00 : f32
    %22 = vector.broadcast %cst_16 : f32 to vector<8x128xf32>
    %23 = arith.maximumf %21, %22 : vector<8x128xf32>
    %cst_17 = arith.constant dense<0.000000e+00> : vector<128xf32>
    %24 = vector.multi_reduction <add>, %23, %cst_17 [0] : vector<8x128xf32> to vector<128xf32>
    %25 = vector.shape_cast %24 : vector<128xf32> to vector<1x128xf32>
    %cst_18 = arith.constant 1.250000e-01 : f32
    %26 = vector.broadcast %cst_18 : f32 to vector<1x128xf32>
    %27 = arith.mulf %25, %26 : vector<1x128xf32>
    %28 = arith.mulf %23, %23 : vector<8x128xf32>
    %cst_19 = arith.constant dense<0.000000e+00> : vector<128xf32>
    %29 = vector.multi_reduction <add>, %28, %cst_19 [0] : vector<8x128xf32> to vector<128xf32>
    %30 = vector.shape_cast %29 : vector<128xf32> to vector<1x128xf32>
    %cst_20 = arith.constant 1.250000e-01 : f32
    %31 = vector.broadcast %cst_20 : f32 to vector<1x128xf32>
    %32 = arith.mulf %30, %31 : vector<1x128xf32>
    %33 = arith.mulf %27, %27 : vector<1x128xf32>
    %34 = arith.subf %32, %33 : vector<1x128xf32>
    %cst_21 = arith.constant 9.99999974E-6 : f32
    %35 = vector.broadcast %cst_21 : f32 to vector<1x128xf32>
    %36 = arith.addf %34, %35 : vector<1x128xf32>
    %37 = math.rsqrt %36 : vector<1x128xf32>
    %38 = vector.broadcast %27 : vector<1x128xf32> to vector<8x128xf32>
    %39 = arith.subf %23, %38 : vector<8x128xf32>
    %40 = vector.broadcast %37 : vector<1x128xf32> to vector<8x128xf32>
    %41 = arith.mulf %39, %40 : vector<8x128xf32>
    %c0_22 = arith.constant 0 : index
    %c0_23 = arith.constant 0 : index
    %42 = vector.load %arg6[%c0_22, %c0_23] : memref<8x1xf32, #tpu.memory_space<vmem>>, vector<8x1xf32>
    %43 = vector.broadcast %42 : vector<8x1xf32> to vector<8x128xf32>
    %44 = arith.mulf %41, %43 : vector<8x128xf32>
    %c0_24 = arith.constant 0 : index
    %c0_25 = arith.constant 0 : index
    %45 = vector.load %arg7[%c0_24, %c0_25] : memref<8x1xf32, #tpu.memory_space<vmem>>, vector<8x1xf32>
    %46 = vector.broadcast %45 : vector<8x1xf32> to vector<8x128xf32>
    %47 = arith.addf %44, %46 : vector<8x128xf32>
    %c0_26 = arith.constant 0 : index
    %c0_27 = arith.constant 0 : index
    %c0_28 = arith.constant 0 : index
    %48 = vector.load %arg8[%c0_26, %c0_27, %c0_28] : memref<1x8x128xf32, #tpu.memory_space<vmem>>, vector<1x8x128xf32>
    %49 = vector.shape_cast %48 : vector<1x8x128xf32> to vector<8x128xf32>
    %50 = vector.shape_cast %47 : vector<8x128xf32> to vector<1x8x128xf32>
    tpu.vector_store %arg8[%c0_26, %c0_27, %c0_28], %50 {strides = array<i32>} : memref<1x8x128xf32, #tpu.memory_space<vmem>>, vector<1x8x128xf32>,
    return
  }
  func.func @transform_0(%arg0: i32, %arg1: i32) -> (i32, i32, i32) {
    %c0_i32 = arith.constant 0 : i32
    %c0_i32_0 = arith.constant 0 : i32
    return %arg0, %c0_i32, %arg1 : i32, i32, i32
  }
  func.func @transform_1(%arg0: i32, %arg1: i32) -> (i32, i32, i32) {
    %c1_i32 = arith.constant 1 : i32
    %0 = arith.addi %arg1, %c1_i32 : i32
    %c1_i32_0 = arith.constant 1 : i32
    %1 = arith.muli %0, %c1_i32_0 : i32
    %c0_i32 = arith.constant 0 : i32
    %c0_i32_1 = arith.constant 0 : i32
    return %arg0, %c0_i32, %1 : i32, i32, i32
  }
  func.func @transform_2(%arg0: i32, %arg1: i32) -> (i32, i32, i32) {
    %c0_i32 = arith.constant 0 : i32
    %c0_i32_0 = arith.constant 0 : i32
    %c0_i32_1 = arith.constant 0 : i32
    %c0_i32_2 = arith.constant 0 : i32
    return %c0_i32, %c0_i32_0, %c0_i32_1 : i32, i32, i32
  }
  func.func @transform_3(%arg0: i32, %arg1: i32) -> (i32, i32) {
    %c0_i32 = arith.constant 0 : i32
    %c0_i32_0 = arith.constant 0 : i32
    %c0_i32_1 = arith.constant 0 : i32
    return %c0_i32, %c0_i32_0 : i32, i32
  }
  func.func @transform_4(%arg0: i32, %arg1: i32) -> (i32, i32) {
    %c0_i32 = arith.constant 0 : i32
    %c0_i32_0 = arith.constant 0 : i32
    %c0_i32_1 = arith.constant 0 : i32
    return %c0_i32, %c0_i32_0 : i32, i32
  }
  func.func @transform_5(%arg0: i32, %arg1: i32) -> (i32, i32) {
    %c0_i32 = arith.constant 0 : i32
    %c0_i32_0 = arith.constant 0 : i32
    %c0_i32_1 = arith.constant 0 : i32
    return %c0_i32, %c0_i32_0 : i32, i32
  }
  func.func @transform_6(%arg0: i32, %arg1: i32) -> (i32, i32, i32) {
    %c0_i32 = arith.constant 0 : i32
    %c0_i32_0 = arith.constant 0 : i32
    return %arg0, %c0_i32, %arg1 : i32, i32, i32
  }
}

</mosaic_0001>

<bundles_post_ra>
// kernel: tpu_custom_call.1
= control target key start
LH: loop header
LB: loop body
LE: loop exit
PB: predicated region body
PF: predicated region fallthrough
CT: control target
= control target key end

     0   :  { %11 = vsyncpa [#allocation3], 0  ;;  %s1121_s0 = inlined_call_operand.vmem [shape: bf16[2,8,256], index: 0, kind: input, shape index: {}]   ;;  %s1122_s1 = inlined_call_operand.hbm [shape: bf16[2,8,256], index: 1, kind: input, shape index: {}]   ;;  %s1123_s2 = inlined_call_operand.vmem [shape: bf16[3,8,8], index: 2, kind: input, shape index: {}]   ;;  %s1124_s3 = inlined_call_operand.vmem [shape: f32[8,1], index: 3, kind: input, shape index: {}]   ;;  %s1125_s4 = inlined_call_operand.vmem [shape: f32[8,1], index: 4, kind: input, shape index: {}]   ;;  %s1126_s5 = inlined_call_operand.vmem [shape: f32[8,1], index: 5, kind: input, shape index: {}]   ;;  %s1127_s6 = inlined_call_operand.hbm [shape: f32[2,8,128], index: 6, kind: output, shape index: {}]  }
   0x1   :  { %13 = vsyncpa [#allocation3 + $0x1], 0 }
   0x2   :  { %14 = vsyncpa [#allocation4], 0 }
   0x3   :  { %16 = vsyncpa [#allocation4 + $0x1], 0  ;;  %s917_s21 = smov 0   ;;  %s919_s22 = smov 0  }
   0x4   :  { %s921_s23 = smov 0   ;;  %s923_s24 = smov 0  }
   0x5   :  { %s925_s25 = smov 0   ;;  %s927_s26 = smov 0  }
   0x6 LB: > { %s642_s27 = sadd.s32 4294967295, %s873_s26   ;;  %s643_s28 = sadd.s32 4294967294, %s873_s26   ;;  %s873_s26 = sphi %s927_s26, %s22_s26   ;;  %s869_s25 = sphi %s925_s25, %s1143_s25   ;;  %s865_s24 = sphi %s923_s24, %s1142_s24   ;;  %s861_s23 = sphi %s921_s23, %s1141_s23   ;;  %s857_s22 = sphi %s919_s22, %s1140_s22   ;;  %s853_s21 = sphi %s917_s21, %s1139_s21  }
   0x7   : > { %s34_s29 = sadd.s32 1, %s869_s25  ;;  %s73_s30 = sadd.s32 1, %s861_s23 }
   0x8   : > { %p36_p0 = scmp.ge.s32.totalorder %s34_s29, 2  ;;  %p80_p1 = scmp.ne.s32.totalorder %s861_s23, %s857_s22 }
   0x9   : > { %p81_p2 = scmp.eq.s32.totalorder %s873_s26, 0  ;;  %p86_p3 = scmp.ne.s32.totalorder %s857_s22, %s853_s21 }
   0xa   : > { %s1145_s29 = smov (%p36_p0, %s34_s29), 0  ;;  %p87_p5 = scmp.eq.s32.totalorder %s642_s27, 0 }
   0xb   : > { %p958_p4 = por %p81_p2, %p80_p1  ;;  %s68_s8 = ssub.s32 %s869_s25, %s1145_s29 }
   0xc   : > { %p196_p6 = scmp.eq.s32.totalorder %s642_s27, 1  ;;  %p71_p7 = scmp.eq.s32.totalorder %s68_s8, 0 }
   0xd   : > { %p964_p8 = por %p87_p5, %p86_p3  ;;  %p202_p10 = scmp.eq.s32.totalorder %s643_s28, 1 }
   0xe   : > { %p968_p9 = por %p196_p6, %p80_p1  ;;  %p701_p13 = scmp.lt.s32.totalorder %s873_s26, 2 }
   0xf   : > { %s973_s11 = scalar_select %p71_p7, %s861_s23, %s73_s30  }
  0x10   : > { %s1131_s10 = scalar_select %p968_p9, 1, 0 }
  0x11   : > { %p975_p11 = por %p202_p10, %p86_p3  ;;  %s245_s13 = sand.u32 1, %s861_s23  }
  0x12   : > { %s646_s14 = sshll.u32 %s245_s13, 2  ;;  %s663_s15 = sshll.u32 %s869_s25, 7 }
  0x13   : > { %s1132_s12 = scalar_select %p975_p11, 1, 0 }
  0x14   : > { %s576_s18 = scalar_lea.hbm %s1122_s1, %s663_s15  ;;  %s249_s19 = scalar_lea.vmem [#allocation2], %s646_s14 }
  0x15   : > { %s259_s20 = sshll.u32 %s249_s19, 4  ;;  %s986_s27 = scalar_lea.hbm %s576_s18, 64  ;;  %s988_s20 = int_to_ptr.vmem [resolvable:$true] %s259_s20 }
  0x16   : > { %p992_p0 = pnand %p701_p13, %p958_p4  ;;  %s246_s30 = scalar_lea.sflag [#allocation3], %s245_s13 }
  0x17   : > { %s790_s8 = scalar_lea.hbm %s576_s18, 128  ;;  %s765_s7 = scalar_lea.hbm %s1122_s1, 256 }
  0x18   : > { %p761_p3 = scmp.ne.s32.totalorder %s986_s27, %s790_s8  ;;  %p762_p5 = pneg %p992_p0 }
  0x19   : > { %p766_p4 = scmp.lt.u32.totalorder %s986_s27, %s1122_s1  ;;  %p767_p10 = scmp.lt.u32.totalorder %s765_s7, %s790_s8 }
  0x1a   : > { %p763_p6 = pnand %p762_p5, %p761_p3  ;;  %p769_p12 = scmp.lt.u32.totalorder %s790_s8, %s986_s27 }
  0x1b   : > { %p768_p13 = por %p767_p10, %p766_p4 }
  0x1c   : > { %p764_p7 = pneg %p763_p6 }
  0x1d   : > { %p770_p1 = por %p769_p12, %p768_p13 }
  0x1f   : > { %p771_p2 = pnand %p770_p1, %p764_p7 }
  0x21   : > { %774 = shalt.err (!%p771_p2)
}
  0x22   : > { %s775_s13 = scalar_lea.vmem %s988_s20, 64  ;;  %s875_s18 = smov [#allocation2]  }
  0x23   : > { %p776_p3 = scmp.ne.s32.totalorder %s988_s20, %s775_s13  ;;  %s780_s19 = sshll.u32 %s875_s18, 4  ;;  %s781_s19 = int_to_ptr.vmem [resolvable:$false] %s780_s19 }
  0x24   : > { %s782_s14 = scalar_lea.vmem %s781_s19, 128  ;;  %p783_p9 = scmp.lt.s32.totalorder %s988_s20, %s781_s19 }
  0x25   : > { %p778_p6 = pnand %p776_p3, %p762_p5  ;;  %p784_p4 = scmp.lt.s32.totalorder %s782_s14, %s775_s13 }
  0x27   : > { %p779_p11 = pneg %p778_p6  ;;  %p785_p10 = por %p784_p4, %p783_p9 }
  0x29   : > { %p786_p12 = pnand %p785_p10, %p779_p11 }
  0x2b   : > { %789 = shalt.err (!%p786_p12)
}
  0x2c   : > { %696 = dma.hbm_to_vmem [thread:$0]  (!%p992_p0), %s986_s27, 64, %s988_s20, %s246_s30  }
  0x2d   : > { %p1134_p1 = scmp.lt.s32.totalorder %s873_s26, 3  ;;  %p1135_p2 = scmp.ge.s32.totalorder %s873_s26, 1 }
  0x2f   : > { %p265_p5 = pnand %p1135_p2, %p1134_p1 }
  0x30   : > { %s1027_s8 = sand.u32 (!%p265_p5), 1, %s857_s22  }
  0x31   : > { %268 = sbr.rel (%p265_p5) target bundleno = 465 (0x1d1), region = 44  ;;  %s650_s15 = sshll.u32 (!%p265_p5), %s1027_s8, 2 }
  0x32   : > { %s271_s7 = scalar_lea.sflag (!%p265_p5), [#allocation3], %s1027_s8  ;;  %s274_s16 = scalar_lea.vmem (!%p265_p5), [#allocation2], %s650_s15 }
  0x38   : > { %844 = dma.done.wait (%p964_p8), %s271_s7, 64  }
  0x39   : > { %846 = vsyncadd (%p964_p8), %s271_s7, 4294967232  ;;  %p311_p9 = scmp.lt.s32.totalorder %s865_s24, 1  ;;  %v876_v0 = vmov 0.0   ;;  %vm877_vm0 = vmmov 0   ;;  %vm338_vm1 = vcmask 1043456   ;;  %s878_s9 = smov 126  }
  0x3a   : > { %671 = vmatprep.subr.bf16.mxu0 %v876_v0  ;;  %677 = vmatprep.subr.bf16.mxu1 %v876_v0  ;;  %s879_s13 = smov 127   ;;  %v322_v3 = vld [vmem:[%s274_s16] sm:$0xf]  ;;  %vm334_vm2 = vcmask 64512   ;;  %v880_v5 = vmov 0   ;;  %vm434_vm3 = vcmask 1031168  }
  0x3b   : > { %s312_s20 = scalar_select %p311_p9, %s865_s24, 1  ;;  %673 = vmatprep.mubr.msk.bf16.mxu0 %vm877_vm0, %v876_v0  ;;  %679 = vmatprep.mubr.msk.bf16.mxu1 %vm877_vm0, %v876_v0  ;;  %v323_v4 = vld [vmem:[%s1123_s2] sm:$0xf]  ;;  %vm332_vm4 = vcmask 1039360   ;;  %v654_v16 = vld [vmem:[%s1123_s2 + $0x4] sm:$0xf] }
  0x3c   : > { %756 = vset.pattern.permute.xlu0 %v880_v5  ;;  %v483_v6 = vld [vmem:[%s1124_s3] sm:$0xff]  ;;  %757 = vset.pattern.permute.xlu1 %v880_v5  ;;  %v657_v18 = vld [vmem:[%s1123_s2 + $0x8] sm:$0xf]  ;;  %s660_s18 = sshll.u32 %s865_s24, 7  ;;  %s528_s16 = scalar_lea.sflag [#allocation4], %s1027_s8 }
  0x3d   : > { %s664_s27 = sshll.u32 %s312_s20, 3  ;;  %v512_v7 = vld [vmem:[%s1125_s4] sm:$0xff]  ;;  %s1072_s20 = scalar_lea.hbm %s1127_s6, %s660_s18 }
  0x3e   : > { %s318_s17 = scalar_lea.vmem %s1121_s0, %s664_s27  ;;  %v519_v8 = vld [vmem:[%s1126_s5] sm:$0xff]  ;;  %p1136_p11 = scmp.ne.s32.totalorder %s1131_s10, 0 }
  0x3f   : > { %v321_v1 = vld [vmem:[%s318_s17] sm:$0xf]  ;;  %s881_s24 = smov [#allocation5]  }
  0x40   : > { %430 = vrot.lane.b32.xlu1 %v321_v1, %s878_s9  ;;  %328 = vrot.lane.b32.xlu0 %v321_v1, %s879_s13  ;;  %v386_v2 = vsel %vm338_vm1, %v321_v1, 0  ;;  %s795_s28 = sshll.u32 %s881_s24, 4  ;;  %s796_s28 = int_to_ptr.vmem [resolvable:$false] %s795_s28 }
  0x41   : > { %678 = vmatpush3.bf16.msra.mxu1 %v386_v2  ;;  %s797_s30 = scalar_lea.vmem %s796_s28, 256 }
  0x44   : > { %432 = vrot.lane.b32.xlu1 %v322_v3, %s878_s9  ;;  %330 = vrot.lane.b32.xlu0 %v322_v3, %s879_s13  ;;  %s651_s13 = sshll.u32 %s1027_s8, 3 }
  0x45   : > { %680 = vmatmul.mubr.msk.bf16.vlgmr.msra.gmra.mrb[0].mxu1 %vm334_vm2, %v323_v4  ;;  %s310_s19 = scalar_lea.vmem [#allocation5], %s651_s13 }
  0x46   : > { %s542_s14 = sshll.u32 %s310_s19, 4  ;;  %s1074_s14 = int_to_ptr.vmem [resolvable:$true] %s542_s14 }
  0x47   : > { %s791_s27 = scalar_lea.vmem %s1074_s14, 128  ;;  %p798_p13 = scmp.lt.s32.totalorder %s1074_s14, %s796_s28 }
  0x48   : > { %486 = vperm.xlu0 %756, %v483_v6   ;;  %515 = vperm.xlu1 %757, %v512_v7   ;;  %p792_p8 = scmp.ne.s32.totalorder %s1074_s14, %s791_s27  ;;  %p799_p3 = scmp.lt.s32.totalorder %s797_s30, %s791_s27 }
  0x4a   : > { %p793_p0 = pnand %p792_p8, %p1136_p11  ;;  %p800_p6 = por %p799_p3, %p798_p13 }
  0x4c   : > { %522 = vperm.xlu1 %757, %v519_v8   ;;  %p794_p7 = pneg %p793_p0 }
  0x4e   : > { %p801_p4 = pnand %p800_p6, %p794_p7 }
  0xb2   : > { %v431_v9 = vpop.permute.xlu1 %430  ;;  %v329_v10 = vpop.permute.xlu0 %328 }
  0xb6   : > { %v433_v11 = vpop.permute.xlu1 %432  ;;  %v331_v12 = vpop.permute.xlu0 %330 }
  0xb7   : > { %v435_v13 = vsel %vm434_vm3, %v431_v9, %v433_v11  ;;  %v333_v14 = vsel %vm332_vm4, %v329_v10, %v331_v12 }
  0xb8   : > { %v340_v15 = vsel %vm338_vm1, %v333_v14, 0  ;;  %v440_v17 = vsel %vm338_vm1, %v435_v13, 0 }
  0xb9   : > { %672 = vmatpush3.bf16.msra.mxu0 %v340_v15 }
  0xba   : > { %683 = vmatprep.subr.bf16.mxu0 %v876_v0 }
  0xbc   : > { %674 = vmatmul.mubr.msk.bf16.vlgmr.msra.gmra.mrb[0].mxu0 %vm334_vm2, %v654_v16 }
  0xbd   : > { %684 = vmatpush3.bf16.msra.mxu0 %v440_v17  ;;  %685 = vmatprep.mubr.msk.bf16.mxu0 %vm877_vm0, %v876_v0 }
  0xc4   : > { %686 = vmatmul.mubr.msk.bf16.vlgmr.msra.gmra.mrb[4].mxu0 %vm334_vm2, %v657_v18 }
  0xc7   : > { %v487_v29 = vpop.permute.xlu0 %486  ;;  %v516_v54 = vpop.permute.xlu1 %515 }
  0xcb   : > { %v523_v59 = vpop.permute.xlu1 %522 }
 0x118   : > { %v422_v19 = vpop.f32.mrb[0].mxu1 }
 0x119   : > { %v681_v20 = vpop.f32.mrb[1].mxu1 }
 0x11a   : > { %v425_v21 = vpop.f32.mrb[2].mxu1 }
 0x11b   : > { %v682_v22 = vpop.f32.mrb[3].mxu1 }
 0x18f   : > { %v376_v23 = vpop.f32.mrb[0].mxu0 }
 0x190   : > { %v675_v24 = vpop.f32.mrb[1].mxu0  ;;  %v423_v25 = vadd.f32 %v422_v19, %v376_v23 }
 0x191   : > { %v379_v26 = vpop.f32.mrb[2].mxu0 }
 0x192   : > { %v676_v27 = vpop.f32.mrb[3].mxu0 }
 0x197   : > { %v476_v28 = vpop.f32.mrb[4].mxu0 }
 0x198   : > { %v482_v30 = vadd.f32 %v476_v28, %v423_v25  ;;  %v687_v31 = vpop.f32.mrb[5].mxu0 }
 0x199   : > { %v479_v32 = vpop.f32.mrb[6].mxu0 }
 0x19a   : > { %v489_v33 = vadd.f32 %v487_v29, %v482_v30  ;;  %v688_v34 = vpop.f32.mrb[7].mxu0 }
 0x19c   : > { %v490_v35 = vmax.f32 %v489_v33, 0.0 }
 0x19e   : > { %v491_v36 = vrot.slane %v490_v35, 4  ;;  %v498_v37 = vmul.f32 %v490_v35, %v490_v35 }
 0x1a0   : > { %v492_v38 = vadd.f32 %v491_v36, %v490_v35  ;;  %v499_v39 = vrot.slane %v498_v37, 4 }
 0x1a2   : > { %v500_v40 = vadd.f32 %v499_v39, %v498_v37  ;;  %v493_v41 = vrot.slane %v492_v38, 2 }
 0x1a4   : > { %v501_v42 = vrot.slane %v500_v40, 2  ;;  %v494_v43 = vadd.f32 %v493_v41, %v492_v38 }
 0x1a6   : > { %v502_v44 = vadd.f32 %v501_v42, %v500_v40  ;;  %v495_v45 = vrot.slane %v494_v43, 1 }
 0x1a8   : > { %v496_v46 = vadd.f32 %v495_v45, %v494_v43  ;;  %v503_v47 = vrot.slane %v502_v44, 1 }
 0x1aa   : > { %v497_v48 = vmul.f32 0.125, %v496_v46  ;;  %v504_v49 = vadd.f32 %v503_v47, %v502_v44 }
 0x1ac   : > { %v505_v50 = vmul.f32 0.125, %v504_v49  ;;  %v506_v51 = vmul.f32 %v497_v48, %v497_v48  ;;  %v510_v55 = vsub.f32 %v490_v35, %v497_v48 }
 0x1ae   : > { %v507_v52 = vsub.f32 %v505_v50, %v506_v51 }
 0x1b0   : > { %v508_v53 = vadd.f32 1e-05, %v507_v52 }
 0x1b2   : > { %758 = vrsqrt.f32 %v508_v53 }
 0x1bc   : > { %v759_v56 = vpop.eup %758 }
 0x1bd   : > { %v511_v57 = vmul.f32 %v759_v56, %v510_v55 }
 0x1bf   : > { %v518_v58 = vmul.f32 %v516_v54, %v511_v57 }
 0x1c1   : > { %v525_v60 = vadd.f32 %v523_v59, %v518_v58 }
 0x1c3   : > { %526 = vst [vmem:[%s310_s19] sm:$0xff] %v525_v60 }
 0x1c4   : > { %804 = shalt.err (!%p801_p4)
}
 0x1c5   : > { %s805_s8 = scalar_lea.hbm %s1072_s20, 128  ;;  %s809_s13 = scalar_lea.hbm %s1127_s6, 256 }
 0x1c6   : > { %p806_p10 = scmp.ne.s32.totalorder %s1072_s20, %s805_s8  ;;  %p810_p2 = scmp.lt.u32.totalorder %s1072_s20, %s1127_s6 }
 0x1c7   : > { %p811_p5 = scmp.lt.u32.totalorder %s809_s13, %s805_s8  ;;  %p813_p8 = scmp.lt.u32.totalorder %s805_s8, %s1072_s20 }
 0x1c8   : > { %p807_p12 = pnand %p806_p10, %p1136_p11 }
 0x1c9   : > { %p812_p9 = por %p811_p5, %p810_p2 }
 0x1ca   : > { %p808_p1 = pneg %p807_p12 }
 0x1cb   : > { %p814_p0 = por %p813_p8, %p812_p9 }
 0x1cd   : > { %p815_p7 = pnand %p814_p0, %p808_p1 }
 0x1cf   : > { %818 = shalt.err (!%p815_p7)
}
 0x1d0   : > { %691 = dma.vmem_to_hbm [thread:$0]  (%p1136_p11), %s1074_s14, 128, %s1072_s20, %s528_s16  }
 0x1d1 PF: > { %s554_s15 = sand.u32 1, %s853_s21   ;;  %p1137_p13 = scmp.ne.s32.totalorder %s1132_s12, 0 }
 0x1d2   : > { %p1138_p3 = scmp.ge.s32.totalorder %s873_s26, 2  ;;  %s555_s7 = scalar_lea.sflag [#allocation4], %s554_s15 }
 0x1d4   : > { %p698_p6 = pnand %p1138_p3, %p1137_p13 }
 0x1d6   : > { %848 = dma.done.wait (!%p698_p6), %s555_s7, 128  }
 0x1d7   : > { %850 = vsyncadd (!%p698_p6), %s555_s7, 4294967168  ;;  %s22_s26 = sadd.s32 1, %s873_s26   ;;  %s1139_s21 = smov %s857_s22 }
 0x1d8   : > { %p19_p4 = scmp.ge.s32.totalorder %s22_s26, 4   ;;  %s1140_s22 = smov %s861_s23 }
 0x1d9   : > { %s1141_s23 = smov %s973_s11  ;;  %s1142_s24 = smov %s869_s25 }
 0x1da   : > { %s1143_s25 = smov %s1145_s29  ;;  %21 = sbr.rel (!%p19_p4) target bundleno = 6 (0x6), region = 94 }
 0x1e1   :  { %560 = vsyncpa [#allocation3], 1 }
 0x1e2   :  { %562 = vsyncpa [#allocation3 + $0x1], 1 }
 0x1e3   :  { %563 = vsyncpa [#allocation4], 1 }
 0x1e4   :  { %565 = vsyncpa [#allocation4 + $0x1], 1 }

</bundles_post_ra>
